<compile_context>
chip_gen: v7x
topology: tpu7x:2x2x1
jax: 0.10.0
libtpu: 0.0.40
codegen_flags: <defaults>
</compile_context>

<pallas_src>
import math
from functools import partial

import jax
import jax.numpy as jnp
from jax.experimental import pallas as pl
from jax.experimental.pallas import tpu as pltpu


def _round_up(a, b):
    return ((a + b - 1) // b) * b


# ----------------------------- Pallas kernel --------------------------------
def _proj_ln_kernel(x_ref, w_ref, p_ref, o_ref):
    # x_ref: (TM, Kp) bf16 patch rows, w_ref: (Kp, D) bf16,
    # p_ref: (3, D) f32 = [bias; gamma; beta], o_ref: (TM, D) f32.
    y = jnp.dot(x_ref[...], w_ref[...], preferred_element_type=jnp.float32)
    y = y + p_ref[0:1, :]                                  # conv bias (pre-LN)

    # One-pass LayerNorm statistics over the embed dim (f32).
    inv_d = 1.0 / y.shape[-1]
    s1 = jnp.sum(y, axis=-1, keepdims=True)
    s2 = jnp.sum(y * y, axis=-1, keepdims=True)
    mean = s1 * inv_d
    var = jnp.maximum(s2 * inv_d - mean * mean, 0.0)       # guard tiny negatives
    y_hat = (y - mean) * jax.lax.rsqrt(var + 1e-5)         # eps = 1e-5 (PyTorch)

    o_ref[...] = (y_hat * p_ref[1:2, :] + p_ref[2:3, :]).astype(o_ref.dtype)


def proj_layernorm(patches, w_flat, bias, gamma, beta, *, tile_m_max=1024):
    """patches: (M, K); w_flat: (K, D); bias/gamma/beta: (D,) -> (M, D) f32."""
    M, K = patches.shape
    D = w_flat.shape[1]

    # Lane-align the contraction dim and pick a large, TPU-friendly row tile.
    Kp = _round_up(K, 128)
    tile_m = min(tile_m_max, _round_up(M, 16))   # mult. of 16 -> bf16 sublane tiling
    grid_m = pl.cdiv(M, tile_m)
    Mp = grid_m * tile_m

    patches_p = jnp.pad(patches.astype(jnp.bfloat16),
                        ((0, Mp - M), (0, Kp - K)))
    w_p = jnp.pad(w_flat.astype(jnp.bfloat16), ((0, Kp - K), (0, 0)))
    params = jnp.stack([bias, gamma, beta], axis=0).astype(jnp.float32)  # (3, D)

    out = pl.pallas_call(
        _proj_ln_kernel,
        out_shape=jax.ShapeDtypeStruct((Mp, D), jnp.float32),
        grid_spec=pltpu.PrefetchScalarGridSpec(
            num_scalar_prefetch=0,
            grid=(grid_m,),
            in_specs=[
                pl.BlockSpec((tile_m, Kp), lambda i: (i, 0)),
                pl.BlockSpec((Kp, D), lambda i: (0, 0)),    # resident (const idx)
                pl.BlockSpec((3, D), lambda i: (0, 0)),     # resident (const idx)
            ],
            out_specs=pl.BlockSpec((tile_m, D), lambda i: (i, 0)),
        ),
        compiler_params=pltpu.CompilerParams(
            dimension_semantics=("parallel",),
        ),
    )(patches_p, w_p, params)
    return out[:M]


# ------------------------------ glue / module -------------------------------
def extract_patches_nchw(x, kh, kw, stride, pad_h, pad_w):
    """im2col for NCHW input (bf16 to halve intermediate bytes).

    Returns (B*Ho*Wo, C*kh*kw) with feature order (c, kh, kw) matching the
    flattened PyTorch Conv2d weight."""
    B, C, H, W = x.shape
    x = x.astype(jnp.bfloat16)
    x_pad = jnp.pad(x, ((0, 0), (0, 0), (pad_h, pad_h), (pad_w, pad_w)))
    Ho = (H + 2 * pad_h - kh) // stride + 1
    Wo = (W + 2 * pad_w - kw) // stride + 1
    cols = []
    for i in range(kh):
        for j in range(kw):
            cols.append(
                x_pad[:, :, i:i + stride * Ho:stride, j:j + stride * Wo:stride]
            )  # (B, C, Ho, Wo)
    p = jnp.stack(cols, axis=2)                  # (B, C, kh*kw, Ho, Wo)
    p = p.transpose(0, 3, 4, 1, 2)               # (B, Ho, Wo, C, kh*kw)
    return p.reshape(B * Ho * Wo, C * kh * kw), Ho, Wo


@partial(jax.jit, static_argnames=("patch_size", "stride", "tile_m_max"))
def _overlap_patch_embed_fwd(x, conv_w, conv_b, gamma, beta, *,
                             patch_size, stride, tile_m_max=1024):
    B = x.shape[0]
    kh = kw = patch_size
    pad = patch_size // 2
    patches, Ho, Wo = extract_patches_nchw(x, kh, kw, stride, pad, pad)
    D = conv_w.shape[0]
    # Flatten conv weight to (C*kh*kw, D) — order matches patch features.
    w_flat = conv_w.reshape(D, -1).T
    out = proj_layernorm(patches, w_flat, conv_b, gamma, beta,
                         tile_m_max=tile_m_max)
    return out.reshape(B, Ho * Wo, D)


class OverlapPatchEmbedPallas:
    def __init__(self, img_size=16, patch_size=7, stride=4, in_chans=4,
                 embed_dim=32, key=None):
        self.patch_size = (patch_size, patch_size)
        self.stride = stride
        self.in_chans = in_chans
        self.embed_dim = embed_dim
        kh, kw = self.patch_size

        key = jax.random.PRNGKey(0) if key is None else key
        # Conv2d init: normal(0, sqrt(2 / fan_out)), fan_out = kh*kw*out_ch
        fan_out = kh * kw * embed_dim
        std = math.sqrt(2.0 / fan_out)
        # weight: (out, in, kh, kw) like PyTorch
        self.conv_w = std * jax.random.normal(
            key, (embed_dim, in_chans, kh, kw), dtype=jnp.float32)
        self.conv_b = jnp.zeros((embed_dim,), jnp.float32)
        # LayerNorm params
        self.ln_gamma = jnp.ones((embed_dim,), jnp.float32)
        self.ln_beta = jnp.zeros((embed_dim,), jnp.float32)

    def __call__(self, x):
        """x: (B, C, H, W) float32 (NCHW).  Returns (tokens, Ho, Wo) where
        tokens: (B, Ho*Wo, embed_dim)."""
        B, C, H, W = x.shape
        kh, kw = self.patch_size
        Ho = (H + 2 * (kh // 2) - kh) // self.stride + 1
        Wo = (W + 2 * (kw // 2) - kw) // self.stride + 1
        tokens = _overlap_patch_embed_fwd(
            x, self.conv_w, self.conv_b, self.ln_gamma, self.ln_beta,
            patch_size=kh, stride=self.stride, tile_m_max=1024)
        return tokens, Ho, Wo


# ----------------------------------- main ------------------------------------
if __name__ == "__main__":
    key = jax.random.PRNGKey(0)
    k_x, k_w = jax.random.split(key)

    B, C, H, W = 2, 4, 16, 16
    embed_dim = 32
    x = jax.random.normal(k_x, (B, C, H, W), dtype=jnp.float32)

    module = OverlapPatchEmbedPallas(img_size=H, patch_size=7, stride=4,
                                     in_chans=C, embed_dim=embed_dim, key=k_w)
    tokens, Ho, Wo = module(x)
    tokens = jax.block_until_ready(tokens)

    # Pure-JAX reference (conv + layernorm) on the same bf16-rounded operands
    # so the check stays tight while the kernel uses bf16 MXU inputs.
    xb = x.astype(jnp.bfloat16).astype(jnp.float32)
    wb = module.conv_w.astype(jnp.bfloat16).astype(jnp.float32)
    ref_conv = jax.lax.conv_general_dilated(
        xb, wb, window_strides=(4, 4), padding=((3, 3), (3, 3)),
        dimension_numbers=("NCHW", "OIHW", "NCHW")) \
        + module.conv_b[None, :, None, None]
    ref = ref_conv.reshape(B, embed_dim, Ho * Wo).transpose(0, 2, 1)
    mu = ref.mean(-1, keepdims=True)
    var = ((ref - mu) ** 2).mean(-1, keepdims=True)
    ref = (ref - mu) / jnp.sqrt(var + 1e-5) * module.ln_gamma + module.ln_beta

    assert tokens.shape == (B, Ho * Wo, embed_dim)
    max_err = float(jnp.max(jnp.abs(tokens - ref)))
    assert jnp.allclose(tokens, ref, atol=1e-2, rtol=1e-2), max_err
    print("KERNEL_OK")
</pallas_src>

<mosaic_0001>
module attributes {stable_mosaic.version = 11 : i64} {
  func.func @_proj_ln_kernel(%arg0: i32, %arg1: memref<32x256xbf16, #tpu.memory_space<vmem>>, %arg2: memref<256x32xbf16, #tpu.memory_space<vmem>>, %arg3: memref<3x32xf32, #tpu.memory_space<vmem>>, %arg4: memref<32x32xf32, #tpu.memory_space<vmem>>) attributes {dimension_semantics = [#tpu.dimension_semantics<parallel>], iteration_bounds = array<i64: 1>, scalar_prefetch = 0 : i64, scratch_operands = 0 : i64, tpu.core_type = #tpu.core_type<tc>, window_params = [{transform_indices = @transform_0, window_bounds = array<i64: 32, 256>}, {pipeline_mode = #tpu.pipeline_mode<synchronous>, transform_indices = @transform_1, window_bounds = array<i64: 256, 32>}, {pipeline_mode = #tpu.pipeline_mode<synchronous>, transform_indices = @transform_2, window_bounds = array<i64: 3, 32>}, {transform_indices = @transform_3, window_bounds = array<i64: 32, 32>}]} {
    %c0 = arith.constant 0 : index
    %c0_0 = arith.constant 0 : index
    %0 = vector.load %arg1[%c0, %c0_0] : memref<32x256xbf16, #tpu.memory_space<vmem>>, vector<32x256xbf16>
    %c0_1 = arith.constant 0 : index
    %c0_2 = arith.constant 0 : index
    %1 = vector.load %arg2[%c0_1, %c0_2] : memref<256x32xbf16, #tpu.memory_space<vmem>>, vector<256x32xbf16>
    %cst = arith.constant dense<0.000000e+00> : vector<32x32xf32>
    %2 = tpu.matmul %0, %1, %cst {dimension_numbers = #tpu.dot_dimension_numbers<[1], [0], [0], [1], [0, 0, 1, 1], [], []>} : vector<32x256xbf16>, vector<256x32xbf16>, vector<32x32xf32> -> vector<32x32xf32>
    %c0_3 = arith.constant 0 : index
    %c0_4 = arith.constant 0 : index
    %3 = vector.load %arg3[%c0_3, %c0_4] : memref<3x32xf32, #tpu.memory_space<vmem>>, vector<1x32xf32>
    %4 = vector.broadcast %3 : vector<1x32xf32> to vector<32x32xf32>
    %5 = arith.addf %2, %4 : vector<32x32xf32>
    %cst_5 = arith.constant dense<0.000000e+00> : vector<32xf32>
    %6 = vector.multi_reduction <add>, %5, %cst_5 [1] : vector<32x32xf32> to vector<32xf32>
    %7 = vector.shape_cast %6 : vector<32xf32> to vector<32x1xf32>
    %8 = arith.mulf %5, %5 : vector<32x32xf32>
    %cst_6 = arith.constant dense<0.000000e+00> : vector<32xf32>
    %9 = vector.multi_reduction <add>, %8, %cst_6 [1] : vector<32x32xf32> to vector<32xf32>
    %10 = vector.shape_cast %9 : vector<32xf32> to vector<32x1xf32>
    %cst_7 = arith.constant 3.125000e-02 : f32
    %11 = vector.broadcast %cst_7 : f32 to vector<32x1xf32>
    %12 = arith.mulf %7, %11 : vector<32x1xf32>
    %cst_8 = arith.constant 3.125000e-02 : f32
    %13 = vector.broadcast %cst_8 : f32 to vector<32x1xf32>
    %14 = arith.mulf %10, %13 : vector<32x1xf32>
    %15 = arith.mulf %12, %12 : vector<32x1xf32>
    %16 = arith.subf %14, %15 : vector<32x1xf32>
    %cst_9 = arith.constant 0.000000e+00 : f32
    %17 = vector.broadcast %cst_9 : f32 to vector<32x1xf32>
    %18 = arith.maximumf %16, %17 : vector<32x1xf32>
    %19 = vector.broadcast %12 : vector<32x1xf32> to vector<32x32xf32>
    %20 = arith.subf %5, %19 : vector<32x32xf32>
    %cst_10 = arith.constant 9.99999974E-6 : f32
    %21 = vector.broadcast %cst_10 : f32 to vector<32x1xf32>
    %22 = arith.addf %18, %21 : vector<32x1xf32>
    %23 = math.rsqrt %22 : vector<32x1xf32>
    %24 = vector.broadcast %23 : vector<32x1xf32> to vector<32x32xf32>
    %25 = arith.mulf %20, %24 : vector<32x32xf32>
    %c1 = arith.constant 1 : index
    %c0_11 = arith.constant 0 : index
    %26 = vector.load %arg3[%c1, %c0_11] : memref<3x32xf32, #tpu.memory_space<vmem>>, vector<1x32xf32>
    %27 = vector.broadcast %26 : vector<1x32xf32> to vector<32x32xf32>
    %28 = arith.mulf %25, %27 : vector<32x32xf32>
    %c2 = arith.constant 2 : index
    %c0_12 = arith.constant 0 : index
    %29 = vector.load %arg3[%c2, %c0_12] : memref<3x32xf32, #tpu.memory_space<vmem>>, vector<1x32xf32>
    %30 = vector.broadcast %29 : vector<1x32xf32> to vector<32x32xf32>
    %31 = arith.addf %28, %30 : vector<32x32xf32>
    %c0_13 = arith.constant 0 : index
    %c0_14 = arith.constant 0 : index
    %32 = vector.load %arg4[%c0_13, %c0_14] : memref<32x32xf32, #tpu.memory_space<vmem>>, vector<32x32xf32>
    tpu.vector_store %arg4[%c0_13, %c0_14], %31 {strides = array<i32>} : memref<32x32xf32, #tpu.memory_space<vmem>>, vector<32x32xf32>,
    return
  }
  func.func @transform_0(%arg0: i32) -> (i32, i32) {
    %c0_i32 = arith.constant 0 : i32
    %c0_i32_0 = arith.constant 0 : i32
    return %arg0, %c0_i32 : i32, i32
  }
  func.func @transform_1(%arg0: i32) -> (i32, i32) {
    %c0_i32 = arith.constant 0 : i32
    %c0_i32_0 = arith.constant 0 : i32
    %c0_i32_1 = arith.constant 0 : i32
    return %c0_i32, %c0_i32_0 : i32, i32
  }
  func.func @transform_2(%arg0: i32) -> (i32, i32) {
    %c0_i32 = arith.constant 0 : i32
    %c0_i32_0 = arith.constant 0 : i32
    %c0_i32_1 = arith.constant 0 : i32
    return %c0_i32, %c0_i32_0 : i32, i32
  }
  func.func @transform_3(%arg0: i32) -> (i32, i32) {
    %c0_i32 = arith.constant 0 : i32
    %c0_i32_0 = arith.constant 0 : i32
    return %arg0, %c0_i32 : i32, i32
  }
}

</mosaic_0001>

<bundles_post_ra>
// kernel: _overlap_patch_embed_fwd.1
= control target key start
LH: loop header
LB: loop body
LE: loop exit
PB: predicated region body
PF: predicated region fallthrough
CT: control target
= control target key end

     0   :  { %s589_s0 = inlined_call_operand.vmem [shape: bf16[32,256], index: 0, kind: input, shape index: {}]   ;;  %s590_s1 = inlined_call_operand.vmem [shape: bf16[256,32], index: 1, kind: input, shape index: {}]   ;;  %s591_s2 = inlined_call_operand.vmem [shape: f32[3,32], index: 2, kind: input, shape index: {}]   ;;  %s592_s3 = inlined_call_operand.hbm [shape: f32[32,32], index: 3, kind: output, shape index: {}]  }
   0x1   :  { %v395_v0 = vld [vmem:[%s590_s1 + $0x40] sm:$0xff]   ;;  %v397_v2 = vld [vmem:[%s590_s1 + $0x48] sm:$0xff]   ;;  %v399_v4 = vld [vmem:[%s590_s1 + $0x50] sm:$0xff]  }
   0x2   :  { %v396_v1 = vld [vmem:[%s590_s1] sm:$0xff]   ;;  %348 = vmatprep.subr.bf16.mxu0 %v395_v0  ;;  %376 = vmatprep.subr.bf16.mxu1 %v395_v0  ;;  %v398_v3 = vld [vmem:[%s590_s1 + $0x8] sm:$0xff]   ;;  %v400_v5 = vld [vmem:[%s590_s1 + $0x10] sm:$0xff]  }
   0x3   :  { %349 = vmatpush3.bf16.msra.mxu0 %v396_v1  ;;  %384 = vmatpush3.bf16.msra.mxu1 %v396_v1  ;;  %v401_v6 = vld [vmem:[%s590_s1 + $0x58] sm:$0xff]   ;;  %v403_v8 = vld [vmem:[%s590_s1 + $0x60] sm:$0xff]   ;;  %v405_v10 = vld [vmem:[%s590_s1 + $0x68] sm:$0xff]  }
   0x4   :  { %350 = vmatprep.subr.bf16.mxu0 %v397_v2  ;;  %377 = vmatprep.subr.bf16.mxu1 %v397_v2  ;;  %v402_v7 = vld [vmem:[%s590_s1 + $0x18] sm:$0xff]   ;;  %v404_v9 = vld [vmem:[%s590_s1 + $0x20] sm:$0xff]  }
   0x5   :  { %v413_v11 = vld [vmem:[%s589_s0 + $0x4] ss:$8 sps:$4 sm:$0xff]   ;;  %v416_v12 = vld [vmem:[%s589_s0 + $0x14] ss:$8 sps:$4 sm:$0xff]  }
   0x7   :  { %351 = vmatpush3.bf16.msra.mxu0 %v398_v3  ;;  %385 = vmatpush3.bf16.msra.mxu1 %v398_v3 }
   0x8   :  { %352 = vmatprep.subr.bf16.mxu0 %v399_v4  ;;  %378 = vmatprep.subr.bf16.mxu1 %v399_v4 }
   0xb   :  { %353 = vmatpush3.bf16.msra.mxu0 %v400_v5  ;;  %386 = vmatpush3.bf16.msra.mxu1 %v400_v5 }
   0xc   :  { %354 = vmatprep.subr.bf16.mxu0 %v401_v6  ;;  %379 = vmatprep.subr.bf16.mxu1 %v401_v6 }
   0xf   :  { %355 = vmatpush3.bf16.msra.mxu0 %v402_v7  ;;  %387 = vmatpush3.bf16.msra.mxu1 %v402_v7 }
  0x10   :  { %356 = vmatprep.subr.bf16.mxu0 %v403_v8  ;;  %380 = vmatprep.subr.bf16.mxu1 %v403_v8 }
  0x11   :  { %8 = vsyncpa [#allocation3], 0  ;;  %v406_v13 = vld [vmem:[%s590_s1 + $0x28] sm:$0xff]   ;;  %v407_v14 = vld [vmem:[%s590_s1 + $0x70] sm:$0xff]   ;;  %205 = vmatprep.mubr.bf16.mxu0 %v413_v11  ;;  %213 = vmatprep.mubr.bf16.mxu1 %v416_v12  ;;  %vm222_vm0 = vcmask 261120   ;;  %s449_s29 = smov [#allocation2]  }
  0x12   :  { %v408_v15 = vld [vmem:[%s590_s1 + $0x30] sm:$0xff]   ;;  %v409_v16 = vld [vmem:[%s590_s1 + $0x78] sm:$0xff]   ;;  %v411_v18 = vld [vmem:[%s589_s0] ss:$8 sps:$4 sm:$0xff]   ;;  %s314_s30 = sshll.u32 %s449_s29, 4  ;;  %s315_s30 = int_to_ptr.vmem [resolvable:$true] %s314_s30 }
  0x13   :  { %357 = vmatpush3.bf16.msra.mxu0 %v404_v9  ;;  %388 = vmatpush3.bf16.msra.mxu1 %v404_v9  ;;  %v410_v17 = vld [vmem:[%s590_s1 + $0x38] sm:$0xff]   ;;  %v325_v22 = vld [vmem:[%s591_s2] ss:$0 sm:$0xff]  ;;  %p430_p1 = scmp.lt.s32.totalorder %s315_s30, %s315_s30 }
  0x14   :  { %358 = vmatprep.subr.bf16.mxu0 %v405_v10  ;;  %381 = vmatprep.subr.bf16.mxu1 %v405_v10  ;;  %v414_v19 = vld [vmem:[%s589_s0 + $0x10] ss:$8 sps:$4 sm:$0xff]  }
  0x17   :  { %359 = vmatpush3.bf16.msra.mxu0 %v406_v13  ;;  %389 = vmatpush3.bf16.msra.mxu1 %v406_v13 }
  0x18   :  { %360 = vmatprep.subr.bf16.mxu0 %v407_v14  ;;  %382 = vmatprep.subr.bf16.mxu1 %v407_v14 }
  0x1b   :  { %361 = vmatpush3.bf16.msra.mxu0 %v408_v15  ;;  %390 = vmatpush3.bf16.msra.mxu1 %v408_v15 }
  0x1c   :  { %362 = vmatprep.subr.bf16.mxu0 %v409_v16  ;;  %383 = vmatprep.subr.bf16.mxu1 %v409_v16 }
  0x1f   :  { %363 = vmatpush3.bf16.msra.mxu0 %v410_v17  ;;  %391 = vmatpush3.bf16.msra.mxu1 %v410_v17 }
  0x22   :  { %206 = vmatmul.mubr.bf16.vlgmr.msra.gmra.mrb[0].mxu0 %v411_v18  ;;  %214 = vmatmul.mubr.bf16.vlgmr.msra.gmra.mrb[0].mxu1 %v414_v19 }
  0xf5   :  { %v364_v20 = vpop.f32.mrb[0].mxu0  ;;  %v370_v21 = vpop.f32.mrb[0].mxu1 }
  0xf6   :  { %v365_v23 = vpop.f32.mrb[1].mxu0  ;;  %v371_v24 = vpop.f32.mrb[1].mxu1 }
  0xf7   :  { %v366_v25 = vadd.f32 %v365_v23, %v364_v20  ;;  %v372_v26 = vadd.f32 %v371_v24, %v370_v21  ;;  %v367_v27 = vpop.f32.mrb[2].mxu0  ;;  %v373_v28 = vpop.f32.mrb[2].mxu1  ;;  %v346_v20 = vld [vmem:[%s591_s2 + $0x1] ss:$0 sm:$0xff]  ;;  %v347_v24 = vld [vmem:[%s591_s2 + $0x2] ss:$0 sm:$0xff] }
  0xf8   :  { %v368_v29 = vpop.f32.mrb[3].mxu0  ;;  %v374_v30 = vpop.f32.mrb[3].mxu1  ;;  %s425_s2 = scalar_lea.vmem %s315_s30, 512 }
  0xf9   :  { %v535_v31 = vadd.f32 %v366_v25, %v325_v22  ;;  %v537_v32 = vadd.f32 %v372_v26, %v325_v22  ;;  %v369_v33 = vadd.f32 %v368_v29, %v367_v27  ;;  %v375_v34 = vadd.f32 %v374_v30, %v373_v28  ;;  %p426_p0 = scmp.ne.s32.totalorder %s315_s30, %s425_s2  ;;  %p431_p2 = scmp.lt.s32.totalorder %s425_s2, %s425_s2 }
  0xfb   :  { %v539_v35 = vadd.f32 %v369_v33, %v325_v22  ;;  %v541_v36 = vadd.f32 %v375_v34, %v325_v22  ;;  %v229_v37 = vsel %vm222_vm0, %v537_v32, 0.0  ;;  %v223_v38 = vsel %vm222_vm0, %v535_v31, 0.0  ;;  %p432_p3 = por %p431_p2, %p430_p1 }
  0xfc   :  { %230 = vadd.xlane.f32.xlu1 %v229_v37  ;;  %224 = vadd.xlane.f32.xlu0 %v223_v38  ;;  %v235_v42 = vmul.f32 %v535_v31, %v535_v31  ;;  %v237_v46 = vmul.f32 %v537_v32, %v537_v32 }
  0xfd   :  { %v232_v39 = vsel %vm222_vm0, %v541_v36, 0.0  ;;  %v226_v40 = vsel %vm222_vm0, %v539_v35, 0.0  ;;  %v236_v41 = vmul.f32 %v539_v35, %v539_v35  ;;  %v238_v45 = vmul.f32 %v541_v36, %v541_v36  ;;  %p433_p4 = pnand %p432_p3, %p426_p0 }
  0xfe   :  { %v239_v44 = vsel %vm222_vm0, %v235_v42, 0.0  ;;  %v245_v48 = vsel %vm222_vm0, %v237_v46, 0.0 }
  0xff   :  { %v242_v43 = vsel %vm222_vm0, %v236_v41, 0.0  ;;  %v248_v47 = vsel %vm222_vm0, %v238_v45, 0.0 }
 0x100   :  { %233 = vadd.xlane.f32.xlu1 %v232_v39  ;;  %227 = vadd.xlane.f32.xlu0 %v226_v40 }
 0x104   :  { %243 = vadd.xlane.f32.xlu1 %v242_v43  ;;  %240 = vadd.xlane.f32.xlu0 %v239_v44 }
 0x108   :  { %249 = vadd.xlane.f32.xlu1 %v248_v47  ;;  %246 = vadd.xlane.f32.xlu0 %v245_v48 }
 0x189   :  { %v231_v49 = vpop.xlane.xlu1 %230  ;;  %v225_v50 = vpop.xlane.xlu0 %224 }
 0x18a   :  { %v251_v53 = vmul.f32 0.03125, %v225_v50  ;;  %v253_v55 = vmul.f32 0.03125, %v231_v49 }
 0x18c   :  { %v259_v59 = vmul.f32 %v251_v53, %v251_v53  ;;  %v261_v1 = vmul.f32 %v253_v55, %v253_v55  ;;  %v271_v19 = vsub.f32 %v535_v31, %v251_v53  ;;  %v273_v28 = vsub.f32 %v537_v32, %v253_v55 }
 0x18d   :  { %v234_v51 = vpop.xlane.xlu1 %233  ;;  %v228_v52 = vpop.xlane.xlu0 %227 }
 0x18e   :  { %v252_v54 = vmul.f32 0.03125, %v228_v52  ;;  %v254_v56 = vmul.f32 0.03125, %v234_v51 }
 0x190   :  { %v260_v60 = vmul.f32 %v252_v54, %v252_v54  ;;  %v262_v2 = vmul.f32 %v254_v56, %v254_v56  ;;  %v272_v17 = vsub.f32 %v539_v35, %v252_v54  ;;  %v274_v25 = vsub.f32 %v541_v36, %v254_v56 }
 0x191   :  { %v244_v57 = vpop.xlane.xlu1 %243  ;;  %v241_v58 = vpop.xlane.xlu0 %240 }
 0x192   :  { %v256_v61 = vmul.f32 0.03125, %v244_v57  ;;  %v255_v62 = vmul.f32 0.03125, %v241_v58 }
 0x194   :  { %v264_v63 = vsub.f32 %v256_v61, %v260_v60  ;;  %v263_v0 = vsub.f32 %v255_v62, %v259_v59 }
 0x195   :  { %v250_v3 = vpop.xlane.xlu1 %249  ;;  %v247_v4 = vpop.xlane.xlu0 %246 }
 0x196   :  { %v268_v5 = vmax.f32 %v264_v63, 0.0  ;;  %v267_v6 = vmax.f32 %v263_v0, 0.0  ;;  %v258_v7 = vmul.f32 0.03125, %v250_v3  ;;  %v257_v8 = vmul.f32 0.03125, %v247_v4 }
 0x198   :  { %v276_v9 = vadd.f32 1e-05, %v268_v5  ;;  %v275_v10 = vadd.f32 1e-05, %v267_v6  ;;  %v266_v11 = vsub.f32 %v258_v7, %v262_v2  ;;  %v265_v12 = vsub.f32 %v257_v8, %v261_v1 }
 0x19a   :  { %417 = vrsqrt.f32 %v276_v9  ;;  %v270_v13 = vmax.f32 %v266_v11, 0.0  ;;  %v269_v14 = vmax.f32 %v265_v12, 0.0 }
 0x19b   :  { %419 = vrsqrt.f32 %v275_v10 }
 0x19c   :  { %v278_v15 = vadd.f32 1e-05, %v270_v13  ;;  %v277_v16 = vadd.f32 1e-05, %v269_v14 }
 0x19e   :  { %421 = vrsqrt.f32 %v278_v15 }
 0x19f   :  { %423 = vrsqrt.f32 %v277_v16 }
 0x1a4   :  { %v418_v18 = vpop.eup %417 }
 0x1a5   :  { %v420_v21 = vpop.eup %419  ;;  %v284_v22 = vmul.f32 %v418_v18, %v272_v17 }
 0x1a6   :  { %v283_v23 = vmul.f32 %v420_v21, %v271_v19 }
 0x1a7   :  { %v293_v26 = vmul.f32 %v346_v20, %v284_v22 }
 0x1a8   :  { %v422_v27 = vpop.eup %421  ;;  %v292_v29 = vmul.f32 %v346_v20, %v283_v23 }
 0x1a9   :  { %v424_v30 = vpop.eup %423  ;;  %v286_v31 = vmul.f32 %v422_v27, %v274_v25  ;;  %v302_v33 = vadd.f32 %v347_v24, %v293_v26 }
 0x1aa   :  { %v285_v34 = vmul.f32 %v424_v30, %v273_v28  ;;  %v301_v35 = vadd.f32 %v347_v24, %v292_v29 }
 0x1ab   :  { %v295_v37 = vmul.f32 %v346_v20, %v286_v31  ;;  %306 = vst.msk [vmem:[#allocation2 + $0x8] sm:$0xff] %vm222_vm0, %v302_v33 }
 0x1ac   :  { %v294_v38 = vmul.f32 %v346_v20, %v285_v34  ;;  %305 = vst.msk [vmem:[#allocation2] sm:$0xff] %vm222_vm0, %v301_v35 }
 0x1ad   :  { %v304_v39 = vadd.f32 %v347_v24, %v295_v37 }
 0x1ae   :  { %v303_v36 = vadd.f32 %v347_v24, %v294_v38 }
 0x1af   :  { %308 = vst.msk [vmem:[#allocation2 + $0x18] sm:$0xff] %vm222_vm0, %v304_v39 }
 0x1b0   :  { %307 = vst.msk [vmem:[#allocation2 + $0x10] sm:$0xff] %vm222_vm0, %v303_v36 }
 0x1b1   :  { %436 = shalt.err (!%p433_p4)
}
 0x1b2   :  { %s437_s6 = scalar_lea.hbm %s592_s3, 512 }
 0x1b3   :  { %p438_p5 = scmp.ne.s32.totalorder %s592_s3, %s437_s6  ;;  %p441_p6 = scmp.lt.u32.totalorder %s437_s6, %s592_s3 }
 0x1b5   :  { %p443_p7 = pnand %p441_p6, %p438_p5 }
 0x1b7   :  { %446 = shalt.err (!%p443_p7)
}
 0x1b8   :  { %s450_s11 = smov 128   ;;  %s451_s12 = smov 8  }
 0x1b9   :  { %320 = dma.vmem_to_hbm [thread:$0]  %s315_s30, 512, %s592_s3, [#allocation3], %s450_s11, %s450_s11, %s451_s12  }
 0x1ba   :  { %447 = dma.done.wait [#allocation3], 512  }
 0x1bb   :  { %448 = vsyncadd [#allocation3], 4294966784 }
 0x1bc   :  { %324 = vsyncpa [#allocation3], 1 }

</bundles_post_ra>
